<compile_context>
chip_gen: v5e
topology: v5e:2x2
jax: 0.10.0
libtpu: 0.0.40
codegen_flags: <defaults>
</compile_context>

<pallas_src>
import functools

import jax
import jax.numpy as jnp
from jax import lax
from jax.experimental import pallas as pl
from jax.experimental.pallas import tpu as pltpu


def _round_up(x, m):
    return ((x + m - 1) // m) * m


def _vmem_limit(block_bytes):
    # Derived from tile math: 4x covers double-buffering + Mosaic internal scratch
    # headroom; cap keeps us comfortably inside v7x's 64 MiB (v5e/v6e have 128 MiB).
    return int(min(max(4 * block_bytes, 8 * 1024 * 1024), 32 * 1024 * 1024))


# ---------------------------------------------------------------------------
# Pass 1: fused RMSNorm + packed QKV projection (runs once per input row).
# ---------------------------------------------------------------------------
def _rmsnorm_qkv_kernel(x_ref, g_ref, w_ref, q_ref, k_ref, v_ref, *,
                        heads, dim_head, hidden):
    """x_ref : (1, rb, dim_p)  bf16 raw input rows (zero-padded channels/rows)
       g_ref : (1, dim_p)      f32 RMSNorm gain (already * sqrt(dim))
       w_ref : (dim_p, 3*hid)  bf16 packed [Wq | Wk | Wv] (softmax scale folded into Wq)
       q/k/v_ref : (1, heads, rb, dim_head) bf16 per-head outputs for the flash pass."""
    x = x_ref[0].astype(jnp.float32)                              # (rb, dim_p)
    ssq = jnp.sum(x * x, axis=-1, keepdims=True)
    # F.normalize(x, dim=channel, eps=1e-12): x / max(||x||, 1e-12); g has sqrt(dim).
    xn = (x * lax.rsqrt(jnp.maximum(ssq, 1e-24)) * g_ref[...]).astype(jnp.bfloat16)

    # Single packed matmul: N = 3*hidden (=384) fully uses the MXU width.
    qkv = jnp.dot(xn, w_ref[...], preferred_element_type=jnp.float32)
    qkv = qkv.astype(jnp.bfloat16)                                # (rb, 3*hidden)

    d = dim_head
    # Head split happens here, once per row (O(n) work), so the O(n^2) attention
    # loop consumes (heads, tile, d) blocks with no in-loop relayout.
    for h in range(heads):
        q_ref[0, h] = qkv[:, h * d:(h + 1) * d]
        k_ref[0, h] = qkv[:, hidden + h * d:hidden + (h + 1) * d]
        v_ref[0, h] = qkv[:, 2 * hidden + h * d:2 * hidden + (h + 1) * d]


# ---------------------------------------------------------------------------
# Pass 2: flash attention over precomputed Q/K/V + fused output projection.
# ---------------------------------------------------------------------------
def _flash_attn_kernel(q_ref, k_ref, v_ref, kvbias_ref, wo_ref, bo_ref, o_ref,
                       m_scr, l_scr, acc_scr, *, masked):
    """q_ref  : (1, heads, tq, d) bf16 (scale already folded into Wq)
       k_ref  : (1, heads, tk, d) bf16
       v_ref  : (1, heads, tk, d) bf16
       kvbias : (1, tk) f32 additive mask (0 valid, -1e30 padded) -- only read if masked
       wo_ref : (hidden, dim_p) bf16 packed output projection
       bo_ref : (1, dim_p) f32 output bias
       o_ref  : (1, tq, dim_p) output rows
       scratch: m/l (heads, tq, 1) f32, acc (heads, tq, d) f32 -- persist over kv axis."""
    ki = pl.program_id(2)

    @pl.when(ki == 0)
    def _init():
        m_scr[...] = jnp.full(m_scr.shape, -jnp.inf, jnp.float32)
        l_scr[...] = jnp.zeros(l_scr.shape, jnp.float32)
        acc_scr[...] = jnp.zeros(acc_scr.shape, jnp.float32)

    q = q_ref[0]                                                  # (heads, tq, d)
    k = k_ref[0]                                                  # (heads, tk, d)
    v = v_ref[0]                                                  # (heads, tk, d)

    # Per-head score tile; contraction K = dim_head (hardware limit, can't widen).
    s = jnp.einsum('hqd,hkd->hqk', q, k, preferred_element_type=jnp.float32)
    if masked:  # static flag: only compiled in when n was padded up to a tile multiple
        s = s + kvbias_ref[...][None]                             # (1,1,tk) broadcast add

    m_prev = m_scr[...]
    m_new = jnp.maximum(m_prev, jnp.max(s, axis=-1, keepdims=True))
    alpha = jnp.exp(m_prev - m_new)
    p = jnp.exp(s - m_new)
    l_scr[...] = alpha * l_scr[...] + jnp.sum(p, axis=-1, keepdims=True)
    acc_scr[...] = alpha * acc_scr[...] + jnp.einsum(
        'hqk,hkd->hqd', p.astype(jnp.bfloat16), v,
        preferred_element_type=jnp.float32)
    m_scr[...] = m_new

    @pl.when(ki == pl.num_programs(2) - 1)
    def _finalize():
        heads = acc_scr.shape[0]
        out = acc_scr[...] * pl.reciprocal(l_scr[...], approx=True)   # (heads, tq, d)
        # Fold heads into the lane axis once per q tile -> single K=hidden matmul.
        out2d = jnp.concatenate([out[h] for h in range(heads)], axis=-1)  # (tq, hidden)
        y = jnp.dot(out2d.astype(jnp.bfloat16), wo_ref[...],
                    preferred_element_type=jnp.float32) + bo_ref[...]
        o_ref[0] = y.astype(o_ref.dtype)


# ---------------------------------------------------------------------------
# Wrapper
# ---------------------------------------------------------------------------
def attention_pallas(x_nchw, g, w_qkv, w_out, b_out, *, heads, dim_head,
                     q_block=256, kv_block=256):
    """x_nchw: (b, dim, H, W). Returns (b, dim, H, W)."""
    b, dim, H, W = x_nchw.shape
    n = H * W
    hidden = heads * dim_head
    dim_p = _round_up(dim, 128)

    def pick(nn, want):
        return _round_up(nn, 8) if nn <= want else want

    blk_q = pick(n, q_block)
    blk_kv = pick(n, kv_block)
    if max(blk_q, blk_kv) % min(blk_q, blk_kv):
        blk_q = blk_kv = min(blk_q, blk_kv)
    n_pad = _round_up(n, max(blk_q, blk_kv))
    masked = n_pad != n

    # --- glue: NCHW -> (b, n_pad, dim_p) channels-last, zero-padded, bf16 stream ---
    x_bnc = jnp.transpose(x_nchw.reshape(b, dim, n), (0, 2, 1))
    x_bnc = jnp.pad(x_bnc, ((0, 0), (0, n_pad - n), (0, dim_p - dim)))
    x_bnc = x_bnc.astype(jnp.bfloat16)

    # --- glue: repack conv weights into packed matmul slabs (tiny, one-time) ---
    scale = float(dim_head) ** -0.5
    w_in = w_qkv.reshape(3 * hidden, dim).T                       # (dim, 3*hidden)
    w_in = jnp.concatenate([w_in[:, :hidden] * scale, w_in[:, hidden:]], axis=1)
    w_in = jnp.pad(w_in, ((0, dim_p - dim), (0, 0))).astype(jnp.bfloat16)

    w_o = w_out.reshape(dim, hidden).T                            # (hidden, dim)
    w_o = jnp.pad(w_o, ((0, 0), (0, dim_p - dim))).astype(jnp.bfloat16)

    g2 = jnp.pad(g.reshape(1, dim) * (float(dim) ** 0.5),
                 ((0, 0), (0, dim_p - dim))).astype(jnp.float32)
    b2 = jnp.pad(b_out.reshape(1, dim), ((0, 0), (0, dim_p - dim))).astype(jnp.float32)

    # Additive kv mask: 0 for valid columns, -1e30 for padded ones. kv tile 0 always
    # holds valid column 0, so the running max is finite before any padded columns.
    col = jnp.arange(n_pad)[None, :]
    kv_bias = jnp.where(col < n, 0.0, -1e30).astype(jnp.float32)

    # ------------------- pass 1: RMSNorm + packed QKV projection -------------------
    rb = blk_q
    proj_block_bytes = (rb * dim_p * 2 + dim_p * 3 * hidden * 2
                        + 3 * heads * rb * dim_head * 2 + dim_p * 4)
    proj_cost = pl.CostEstimate(
        flops=int(2 * b * n_pad * dim_p * 3 * hidden),
        transcendentals=int(b * n_pad),
        bytes_accessed=int(x_bnc.size * 2 + 3 * b * n_pad * hidden * 2 + w_in.size * 2))

    qkv_shape = jax.ShapeDtypeStruct((b, heads, n_pad, dim_head), jnp.bfloat16)
    q_a, k_a, v_a = pl.pallas_call(
        functools.partial(_rmsnorm_qkv_kernel, heads=heads, dim_head=dim_head,
                          hidden=hidden),
        out_shape=(qkv_shape, qkv_shape, qkv_shape),
        grid=(b, n_pad // rb),
        in_specs=[
            pl.BlockSpec((1, rb, dim_p), lambda bi, ri: (bi, ri, 0)),       # x rows
            pl.BlockSpec((1, dim_p), lambda bi, ri: (0, 0)),                # g
            pl.BlockSpec((dim_p, 3 * hidden), lambda bi, ri: (0, 0)),       # packed Wqkv
        ],
        out_specs=(
            pl.BlockSpec((1, heads, rb, dim_head), lambda bi, ri: (bi, 0, ri, 0)),
            pl.BlockSpec((1, heads, rb, dim_head), lambda bi, ri: (bi, 0, ri, 0)),
            pl.BlockSpec((1, heads, rb, dim_head), lambda bi, ri: (bi, 0, ri, 0)),
        ),
        compiler_params=pltpu.CompilerParams(
            dimension_semantics=("parallel", "parallel"),
            vmem_limit_bytes=_vmem_limit(proj_block_bytes)),
        cost_estimate=proj_cost,
    )(x_bnc, g2, w_in)

    # ------------------- pass 2: flash attention + output projection ---------------
    n_q = n_pad // blk_q
    n_kv = n_pad // blk_kv
    attn_block_bytes = (heads * blk_q * dim_head * 2
                        + 2 * heads * blk_kv * dim_head * 2
                        + blk_q * dim_p * 4
                        + hidden * dim_p * 2 + dim_p * 4 + blk_kv * 4
                        + heads * blk_q * (dim_head + 2) * 4)
    attn_cost = pl.CostEstimate(
        flops=int(4 * b * heads * n_pad * n_pad * dim_head
                  + 2 * b * n_pad * hidden * dim_p),
        transcendentals=int(b * heads * n_pad * n_pad + b * heads * n_pad),
        bytes_accessed=int(b * n_pad * hidden * 2                    # Q (once per row)
                           + 2 * b * n_q * n_pad * hidden * 2        # K,V re-streamed / q tile
                           + b * n_pad * dim_p * 4 + w_o.size * 2))  # output + Wo

    out_pad = pl.pallas_call(
        functools.partial(_flash_attn_kernel, masked=masked),
        out_shape=jax.ShapeDtypeStruct((b, n_pad, dim_p), x_nchw.dtype),
        grid=(b, n_q, n_kv),
        in_specs=[
            pl.BlockSpec((1, heads, blk_q, dim_head), lambda bi, qi, ki: (bi, 0, qi, 0)),
            pl.BlockSpec((1, heads, blk_kv, dim_head), lambda bi, qi, ki: (bi, 0, ki, 0)),
            pl.BlockSpec((1, heads, blk_kv, dim_head), lambda bi, qi, ki: (bi, 0, ki, 0)),
            pl.BlockSpec((1, blk_kv), lambda bi, qi, ki: (0, ki)),          # mask bias
            pl.BlockSpec((hidden, dim_p), lambda bi, qi, ki: (0, 0)),       # Wo
            pl.BlockSpec((1, dim_p), lambda bi, qi, ki: (0, 0)),            # bias
        ],
        out_specs=pl.BlockSpec((1, blk_q, dim_p), lambda bi, qi, ki: (bi, qi, 0)),
        scratch_shapes=[
            pltpu.VMEM((heads, blk_q, 1), jnp.float32),       # running max
            pltpu.VMEM((heads, blk_q, 1), jnp.float32),       # running denom
            pltpu.VMEM((heads, blk_q, dim_head), jnp.float32),  # running numer
        ],
        compiler_params=pltpu.CompilerParams(
            dimension_semantics=("parallel", "parallel", "arbitrary"),
            vmem_limit_bytes=_vmem_limit(attn_block_bytes)),
        cost_estimate=attn_cost,
    )(q_a, k_a, v_a, kv_bias, w_o, b2)

    # --- glue: strip padding, (b, n, dim) -> NCHW ---
    out = out_pad[:, :n, :dim]
    return jnp.transpose(out, (0, 2, 1)).reshape(b, dim, H, W)


# ---------------------------------------------------------------------------
# Pure-JAX f32 reference matching the PyTorch module semantics.
# ---------------------------------------------------------------------------
def attention_reference(x_nchw, g, w_qkv, w_out, b_out, *, heads, dim_head):
    b, dim, H, W = x_nchw.shape
    n = H * W
    hidden = heads * dim_head

    norm = jnp.sqrt(jnp.sum(x_nchw * x_nchw, axis=1, keepdims=True))
    xn = x_nchw / jnp.maximum(norm, 1e-12)
    xn = xn * g * (float(dim) ** 0.5)

    xf = xn.reshape(b, dim, n)
    qkv = jnp.einsum('oc,bcn->bon', w_qkv.reshape(3 * hidden, dim), xf)
    q, k, v = jnp.split(qkv, 3, axis=1)

    def to_heads(t):   # 'b (h c) (x y) -> b h (x y) c'
        return jnp.transpose(t.reshape(b, heads, dim_head, n), (0, 1, 3, 2))

    q, k, v = map(to_heads, (q, k, v))
    sim = jnp.einsum('bhid,bhjd->bhij', q, k) * (float(dim_head) ** -0.5)
    attn = jax.nn.softmax(sim, axis=-1)
    out = jnp.einsum('bhij,bhjd->bhid', attn, v)

    out = jnp.transpose(out, (0, 1, 3, 2)).reshape(b, hidden, n)
    y = jnp.einsum('oc,bcn->bon', w_out.reshape(dim, hidden), out)
    y = y + b_out.reshape(1, dim, 1)
    return y.reshape(b, dim, H, W)


if __name__ == "__main__":
    # small shapes consistent with Attention(dim=8, heads=4, dim_head=32)
    b, dim, H, W = 2, 8, 8, 8
    heads, dim_head = 4, 32
    hidden = heads * dim_head

    key = jax.random.PRNGKey(0)
    kx, kg, kq, kw, kb = jax.random.split(key, 5)

    x = jax.random.normal(kx, (b, dim, H, W), dtype=jnp.float32)
    g = 1.0 + 0.1 * jax.random.normal(kg, (1, dim, 1, 1), dtype=jnp.float32)
    w_qkv = 0.1 * jax.random.normal(kq, (3 * hidden, dim, 1, 1), dtype=jnp.float32)
    w_out = 0.1 * jax.random.normal(kw, (dim, hidden, 1, 1), dtype=jnp.float32)
    b_out = 0.1 * jax.random.normal(kb, (dim,), dtype=jnp.float32)

    out = attention_pallas(x, g, w_qkv, w_out, b_out, heads=heads, dim_head=dim_head)
    out = jax.block_until_ready(out)

    ref = attention_reference(x, g, w_qkv, w_out, b_out, heads=heads, dim_head=dim_head)
    assert out.shape == (b, dim, H, W)
    # bf16 MXU operands (f32 accumulation) -> compare at a bf16-appropriate tolerance
    max_err = float(jnp.max(jnp.abs(out - ref)))
    assert jnp.allclose(out, ref, atol=2e-2, rtol=2e-2), \
        f"mismatch vs reference, max|err|={max_err}"

    print("KERNEL_OK")
</pallas_src>

<mosaic_0001>
module attributes {stable_mosaic.version = 11 : i64} {
  func.func @_rmsnorm_qkv_kernel(%arg0: i32, %arg1: i32, %arg2: memref<1x64x128xbf16, #tpu.memory_space<vmem>>, %arg3: memref<1x128xf32, #tpu.memory_space<vmem>>, %arg4: memref<128x384xbf16, #tpu.memory_space<vmem>>, %arg5: memref<1x4x64x32xbf16, #tpu.memory_space<vmem>>, %arg6: memref<1x4x64x32xbf16, #tpu.memory_space<vmem>>, %arg7: memref<1x4x64x32xbf16, #tpu.memory_space<vmem>>) attributes {dimension_semantics = [#tpu.dimension_semantics<parallel>, #tpu.dimension_semantics<parallel>], iteration_bounds = array<i64: 2, 1>, scalar_prefetch = 0 : i64, scratch_operands = 0 : i64, tpu.core_type = #tpu.core_type<tc>, window_params = [{transform_indices = @transform_0, window_bounds = array<i64: 1, 64, 128>}, {pipeline_mode = #tpu.pipeline_mode<synchronous>, transform_indices = @transform_1, window_bounds = array<i64: 1, 128>}, {pipeline_mode = #tpu.pipeline_mode<synchronous>, transform_indices = @transform_2, window_bounds = array<i64: 128, 384>}, {transform_indices = @transform_3, window_bounds = array<i64: 1, 4, 64, 32>}, {transform_indices = @transform_4, window_bounds = array<i64: 1, 4, 64, 32>}, {transform_indices = @transform_5, window_bounds = array<i64: 1, 4, 64, 32>}]} {
    %c0 = arith.constant 0 : index
    %c0_0 = arith.constant 0 : index
    %c0_1 = arith.constant 0 : index
    %0 = vector.load %arg2[%c0, %c0_0, %c0_1] : memref<1x64x128xbf16, #tpu.memory_space<vmem>>, vector<1x64x128xbf16>
    %1 = vector.shape_cast %0 : vector<1x64x128xbf16> to vector<64x128xbf16>
    %2 = arith.extf %1 : vector<64x128xbf16> to vector<64x128xf32>
    %3 = arith.mulf %2, %2 : vector<64x128xf32>
    %cst = arith.constant dense<0.000000e+00> : vector<64xf32>
    %4 = vector.multi_reduction <add>, %3, %cst [1] : vector<64x128xf32> to vector<64xf32>
    %5 = vector.shape_cast %4 : vector<64xf32> to vector<64x1xf32>
    %cst_2 = arith.constant 1.000000e-24 : f32
    %6 = vector.broadcast %cst_2 : f32 to vector<64x1xf32>
    %7 = arith.maximumf %5, %6 : vector<64x1xf32>
    %8 = math.rsqrt %7 : vector<64x1xf32>
    %9 = vector.broadcast %8 : vector<64x1xf32> to vector<64x128xf32>
    %10 = arith.mulf %2, %9 : vector<64x128xf32>
    %c0_3 = arith.constant 0 : index
    %c0_4 = arith.constant 0 : index
    %11 = vector.load %arg3[%c0_3, %c0_4] : memref<1x128xf32, #tpu.memory_space<vmem>>, vector<1x128xf32>
    %12 = vector.broadcast %11 : vector<1x128xf32> to vector<64x128xf32>
    %13 = arith.mulf %10, %12 : vector<64x128xf32>
    %14 = arith.truncf %13 : vector<64x128xf32> to vector<64x128xbf16>
    %c0_5 = arith.constant 0 : index
    %c0_6 = arith.constant 0 : index
    %15 = vector.load %arg4[%c0_5, %c0_6] : memref<128x384xbf16, #tpu.memory_space<vmem>>, vector<128x384xbf16>
    %cst_7 = arith.constant dense<0.000000e+00> : vector<64x384xf32>
    %16 = tpu.matmul %14, %15, %cst_7 {dimension_numbers = #tpu.dot_dimension_numbers<[1], [0], [0], [1], [0, 0, 1, 1], [], []>} : vector<64x128xbf16>, vector<128x384xbf16>, vector<64x384xf32> -> vector<64x384xf32>
    %17 = arith.truncf %16 : vector<64x384xf32> to vector<64x384xbf16>
    %18 = vector.extract_strided_slice %17 {offsets = [0, 0], sizes = [64, 32], strides = [1, 1]} : vector<64x384xbf16> to vector<64x32xbf16>
    %c0_8 = arith.constant 0 : index
    %c0_9 = arith.constant 0 : index
    %c0_10 = arith.constant 0 : index
    %c0_11 = arith.constant 0 : index
    %19 = vector.load %arg5[%c0_8, %c0_9, %c0_10, %c0_11] : memref<1x4x64x32xbf16, #tpu.memory_space<vmem>>, vector<1x1x64x32xbf16>
    %20 = vector.shape_cast %19 : vector<1x1x64x32xbf16> to vector<64x32xbf16>
    %21 = vector.shape_cast %18 : vector<64x32xbf16> to vector<1x1x64x32xbf16>
    tpu.vector_store %arg5[%c0_8, %c0_9, %c0_10, %c0_11], %21 {strides = array<i32>} : memref<1x4x64x32xbf16, #tpu.memory_space<vmem>>, vector<1x1x64x32xbf16>,
    %22 = vector.extract_strided_slice %17 {offsets = [0, 128], sizes = [64, 32], strides = [1, 1]} : vector<64x384xbf16> to vector<64x32xbf16>
    %c0_12 = arith.constant 0 : index
    %c0_13 = arith.constant 0 : index
    %c0_14 = arith.constant 0 : index
    %c0_15 = arith.constant 0 : index
    %23 = vector.load %arg6[%c0_12, %c0_13, %c0_14, %c0_15] : memref<1x4x64x32xbf16, #tpu.memory_space<vmem>>, vector<1x1x64x32xbf16>
    %24 = vector.shape_cast %23 : vector<1x1x64x32xbf16> to vector<64x32xbf16>
    %25 = vector.shape_cast %22 : vector<64x32xbf16> to vector<1x1x64x32xbf16>
    tpu.vector_store %arg6[%c0_12, %c0_13, %c0_14, %c0_15], %25 {strides = array<i32>} : memref<1x4x64x32xbf16, #tpu.memory_space<vmem>>, vector<1x1x64x32xbf16>,
    %26 = vector.extract_strided_slice %17 {offsets = [0, 256], sizes = [64, 32], strides = [1, 1]} : vector<64x384xbf16> to vector<64x32xbf16>
    %c0_16 = arith.constant 0 : index
    %c0_17 = arith.constant 0 : index
    %c0_18 = arith.constant 0 : index
    %c0_19 = arith.constant 0 : index
    %27 = vector.load %arg7[%c0_16, %c0_17, %c0_18, %c0_19] : memref<1x4x64x32xbf16, #tpu.memory_space<vmem>>, vector<1x1x64x32xbf16>
    %28 = vector.shape_cast %27 : vector<1x1x64x32xbf16> to vector<64x32xbf16>
    %29 = vector.shape_cast %26 : vector<64x32xbf16> to vector<1x1x64x32xbf16>
    tpu.vector_store %arg7[%c0_16, %c0_17, %c0_18, %c0_19], %29 {strides = array<i32>} : memref<1x4x64x32xbf16, #tpu.memory_space<vmem>>, vector<1x1x64x32xbf16>,
    %30 = vector.extract_strided_slice %17 {offsets = [0, 32], sizes = [64, 32], strides = [1, 1]} : vector<64x384xbf16> to vector<64x32xbf16>
    %c0_20 = arith.constant 0 : index
    %c1 = arith.constant 1 : index
    %c0_21 = arith.constant 0 : index
    %c0_22 = arith.constant 0 : index
    %31 = vector.load %arg5[%c0_20, %c1, %c0_21, %c0_22] : memref<1x4x64x32xbf16, #tpu.memory_space<vmem>>, vector<1x1x64x32xbf16>
    %32 = vector.shape_cast %31 : vector<1x1x64x32xbf16> to vector<64x32xbf16>
    %33 = vector.shape_cast %30 : vector<64x32xbf16> to vector<1x1x64x32xbf16>
    tpu.vector_store %arg5[%c0_20, %c1, %c0_21, %c0_22], %33 {strides = array<i32>} : memref<1x4x64x32xbf16, #tpu.memory_space<vmem>>, vector<1x1x64x32xbf16>,
    %34 = vector.extract_strided_slice %17 {offsets = [0, 160], sizes = [64, 32], strides = [1, 1]} : vector<64x384xbf16> to vector<64x32xbf16>
    %c0_23 = arith.constant 0 : index
    %c1_24 = arith.constant 1 : index
    %c0_25 = arith.constant 0 : index
    %c0_26 = arith.constant 0 : index
    %35 = vector.load %arg6[%c0_23, %c1_24, %c0_25, %c0_26] : memref<1x4x64x32xbf16, #tpu.memory_space<vmem>>, vector<1x1x64x32xbf16>
    %36 = vector.shape_cast %35 : vector<1x1x64x32xbf16> to vector<64x32xbf16>
    %37 = vector.shape_cast %34 : vector<64x32xbf16> to vector<1x1x64x32xbf16>
    tpu.vector_store %arg6[%c0_23, %c1_24, %c0_25, %c0_26], %37 {strides = array<i32>} : memref<1x4x64x32xbf16, #tpu.memory_space<vmem>>, vector<1x1x64x32xbf16>,
    %38 = vector.extract_strided_slice %17 {offsets = [0, 288], sizes = [64, 32], strides = [1, 1]} : vector<64x384xbf16> to vector<64x32xbf16>
    %c0_27 = arith.constant 0 : index
    %c1_28 = arith.constant 1 : index
    %c0_29 = arith.constant 0 : index
    %c0_30 = arith.constant 0 : index
    %39 = vector.load %arg7[%c0_27, %c1_28, %c0_29, %c0_30] : memref<1x4x64x32xbf16, #tpu.memory_space<vmem>>, vector<1x1x64x32xbf16>
    %40 = vector.shape_cast %39 : vector<1x1x64x32xbf16> to vector<64x32xbf16>
    %41 = vector.shape_cast %38 : vector<64x32xbf16> to vector<1x1x64x32xbf16>
    tpu.vector_store %arg7[%c0_27, %c1_28, %c0_29, %c0_30], %41 {strides = array<i32>} : memref<1x4x64x32xbf16, #tpu.memory_space<vmem>>, vector<1x1x64x32xbf16>,
    %42 = vector.extract_strided_slice %17 {offsets = [0, 64], sizes = [64, 32], strides = [1, 1]} : vector<64x384xbf16> to vector<64x32xbf16>
    %c0_31 = arith.constant 0 : index
    %c2 = arith.constant 2 : index
    %c0_32 = arith.constant 0 : index
    %c0_33 = arith.constant 0 : index
    %43 = vector.load %arg5[%c0_31, %c2, %c0_32, %c0_33] : memref<1x4x64x32xbf16, #tpu.memory_space<vmem>>, vector<1x1x64x32xbf16>
    %44 = vector.shape_cast %43 : vector<1x1x64x32xbf16> to vector<64x32xbf16>
    %45 = vector.shape_cast %42 : vector<64x32xbf16> to vector<1x1x64x32xbf16>
    tpu.vector_store %arg5[%c0_31, %c2, %c0_32, %c0_33], %45 {strides = array<i32>} : memref<1x4x64x32xbf16, #tpu.memory_space<vmem>>, vector<1x1x64x32xbf16>,
    %46 = vector.extract_strided_slice %17 {offsets = [0, 192], sizes = [64, 32], strides = [1, 1]} : vector<64x384xbf16> to vector<64x32xbf16>
    %c0_34 = arith.constant 0 : index
    %c2_35 = arith.constant 2 : index
    %c0_36 = arith.constant 0 : index
    %c0_37 = arith.constant 0 : index
    %47 = vector.load %arg6[%c0_34, %c2_35, %c0_36, %c0_37] : memref<1x4x64x32xbf16, #tpu.memory_space<vmem>>, vector<1x1x64x32xbf16>
    %48 = vector.shape_cast %47 : vector<1x1x64x32xbf16> to vector<64x32xbf16>
    %49 = vector.shape_cast %46 : vector<64x32xbf16> to vector<1x1x64x32xbf16>
    tpu.vector_store %arg6[%c0_34, %c2_35, %c0_36, %c0_37], %49 {strides = array<i32>} : memref<1x4x64x32xbf16, #tpu.memory_space<vmem>>, vector<1x1x64x32xbf16>,
    %50 = vector.extract_strided_slice %17 {offsets = [0, 320], sizes = [64, 32], strides = [1, 1]} : vector<64x384xbf16> to vector<64x32xbf16>
    %c0_38 = arith.constant 0 : index
    %c2_39 = arith.constant 2 : index
    %c0_40 = arith.constant 0 : index
    %c0_41 = arith.constant 0 : index
    %51 = vector.load %arg7[%c0_38, %c2_39, %c0_40, %c0_41] : memref<1x4x64x32xbf16, #tpu.memory_space<vmem>>, vector<1x1x64x32xbf16>
    %52 = vector.shape_cast %51 : vector<1x1x64x32xbf16> to vector<64x32xbf16>
    %53 = vector.shape_cast %50 : vector<64x32xbf16> to vector<1x1x64x32xbf16>
    tpu.vector_store %arg7[%c0_38, %c2_39, %c0_40, %c0_41], %53 {strides = array<i32>} : memref<1x4x64x32xbf16, #tpu.memory_space<vmem>>, vector<1x1x64x32xbf16>,
    %54 = vector.extract_strided_slice %17 {offsets = [0, 96], sizes = [64, 32], strides = [1, 1]} : vector<64x384xbf16> to vector<64x32xbf16>
    %c0_42 = arith.constant 0 : index
    %c3 = arith.constant 3 : index
    %c0_43 = arith.constant 0 : index
    %c0_44 = arith.constant 0 : index
    %55 = vector.load %arg5[%c0_42, %c3, %c0_43, %c0_44] : memref<1x4x64x32xbf16, #tpu.memory_space<vmem>>, vector<1x1x64x32xbf16>
    %56 = vector.shape_cast %55 : vector<1x1x64x32xbf16> to vector<64x32xbf16>
    %57 = vector.shape_cast %54 : vector<64x32xbf16> to vector<1x1x64x32xbf16>
    tpu.vector_store %arg5[%c0_42, %c3, %c0_43, %c0_44], %57 {strides = array<i32>} : memref<1x4x64x32xbf16, #tpu.memory_space<vmem>>, vector<1x1x64x32xbf16>,
    %58 = vector.extract_strided_slice %17 {offsets = [0, 224], sizes = [64, 32], strides = [1, 1]} : vector<64x384xbf16> to vector<64x32xbf16>
    %c0_45 = arith.constant 0 : index
    %c3_46 = arith.constant 3 : index
    %c0_47 = arith.constant 0 : index
    %c0_48 = arith.constant 0 : index
    %59 = vector.load %arg6[%c0_45, %c3_46, %c0_47, %c0_48] : memref<1x4x64x32xbf16, #tpu.memory_space<vmem>>, vector<1x1x64x32xbf16>
    %60 = vector.shape_cast %59 : vector<1x1x64x32xbf16> to vector<64x32xbf16>
    %61 = vector.shape_cast %58 : vector<64x32xbf16> to vector<1x1x64x32xbf16>
    tpu.vector_store %arg6[%c0_45, %c3_46, %c0_47, %c0_48], %61 {strides = array<i32>} : memref<1x4x64x32xbf16, #tpu.memory_space<vmem>>, vector<1x1x64x32xbf16>,
    %62 = vector.extract_strided_slice %17 {offsets = [0, 352], sizes = [64, 32], strides = [1, 1]} : vector<64x384xbf16> to vector<64x32xbf16>
    %c0_49 = arith.constant 0 : index
    %c3_50 = arith.constant 3 : index
    %c0_51 = arith.constant 0 : index
    %c0_52 = arith.constant 0 : index
    %63 = vector.load %arg7[%c0_49, %c3_50, %c0_51, %c0_52] : memref<1x4x64x32xbf16, #tpu.memory_space<vmem>>, vector<1x1x64x32xbf16>
    %64 = vector.shape_cast %63 : vector<1x1x64x32xbf16> to vector<64x32xbf16>
    %65 = vector.shape_cast %62 : vector<64x32xbf16> to vector<1x1x64x32xbf16>
    tpu.vector_store %arg7[%c0_49, %c3_50, %c0_51, %c0_52], %65 {strides = array<i32>} : memref<1x4x64x32xbf16, #tpu.memory_space<vmem>>, vector<1x1x64x32xbf16>,
    return
  }
  func.func @transform_0(%arg0: i32, %arg1: i32) -> (i32, i32, i32) {
    %c0_i32 = arith.constant 0 : i32
    %c0_i32_0 = arith.constant 0 : i32
    return %arg0, %arg1, %c0_i32 : i32, i32, i32
  }
  func.func @transform_1(%arg0: i32, %arg1: i32) -> (i32, i32) {
    %c0_i32 = arith.constant 0 : i32
    %c0_i32_0 = arith.constant 0 : i32
    %c0_i32_1 = arith.constant 0 : i32
    return %c0_i32, %c0_i32_0 : i32, i32
  }
  func.func @transform_2(%arg0: i32, %arg1: i32) -> (i32, i32) {
    %c0_i32 = arith.constant 0 : i32
    %c0_i32_0 = arith.constant 0 : i32
    %c0_i32_1 = arith.constant 0 : i32
    return %c0_i32, %c0_i32_0 : i32, i32
  }
  func.func @transform_3(%arg0: i32, %arg1: i32) -> (i32, i32, i32, i32) {
    %c0_i32 = arith.constant 0 : i32
    %c0_i32_0 = arith.constant 0 : i32
    %c0_i32_1 = arith.constant 0 : i32
    return %arg0, %c0_i32, %arg1, %c0_i32_0 : i32, i32, i32, i32
  }
  func.func @transform_4(%arg0: i32, %arg1: i32) -> (i32, i32, i32, i32) {
    %c0_i32 = arith.constant 0 : i32
    %c0_i32_0 = arith.constant 0 : i32
    %c0_i32_1 = arith.constant 0 : i32
    return %arg0, %c0_i32, %arg1, %c0_i32_0 : i32, i32, i32, i32
  }
  func.func @transform_5(%arg0: i32, %arg1: i32) -> (i32, i32, i32, i32) {
    %c0_i32 = arith.constant 0 : i32
    %c0_i32_0 = arith.constant 0 : i32
    %c0_i32_1 = arith.constant 0 : i32
    return %arg0, %c0_i32, %arg1, %c0_i32_0 : i32, i32, i32, i32
  }
}

</mosaic_0001>

<bundles_post_ra>
// kernel: tpu_custom_call.1
= control target key start
LH: loop header
LB: loop body
LE: loop exit
PB: predicated region body
PF: predicated region fallthrough
CT: control target
= control target key end

     0   :  { %11 = vsyncpa [#allocation3], 0  ;;  %s2316_s0 = inlined_call_operand.hbm [shape: bf16[2,64,128], index: 0, kind: input, shape index: {}]   ;;  %s2317_s1 = inlined_call_operand.hbm [shape: f32[1,128], index: 1, kind: input, shape index: {}]   ;;  %s2318_s2 = inlined_call_operand.hbm [shape: bf16[128,384], index: 2, kind: input, shape index: {}]   ;;  %s2319_s3 = inlined_call_operand.vmem [shape: bf16[2,4,64,32], index: 3, kind: output, shape index: {0}]   ;;  %s2320_s4 = inlined_call_operand.vmem [shape: bf16[2,4,64,32], index: 4, kind: output, shape index: {1}]   ;;  %s2321_s5 = inlined_call_operand.vmem [shape: bf16[2,4,64,32], index: 5, kind: output, shape index: {2}]  }
   0x1   :  { %13 = vsyncpa [#allocation3 + $0x1], 0 }
   0x2   :  { %14 = vsyncpa [#allocation5], 0  ;;  %s1841_s18 = smov 0   ;;  %s1843_s19 = smov 0  }
   0x3   :  { %s1845_s20 = smov 0   ;;  %s1847_s21 = smov 0  }
   0x4   :  { %s1849_s22 = smov 0   ;;  %s1851_s23 = smov 0  }
   0x5 LB: > { %s1312_s24 = sadd.s32 4294967295, %s1800_s23   ;;  %s41_s25 = sadd.s32 1, %s1788_s20  ;;  %s1800_s23 = sphi %s1851_s23, %s20_s23   ;;  %s1796_s22 = sphi %s1849_s22, %s2339_s22   ;;  %s1792_s21 = sphi %s1847_s21, %s2338_s21   ;;  %s1788_s20 = sphi %s1845_s20, %s2337_s20   ;;  %s1784_s19 = sphi %s1843_s19, %s2336_s19   ;;  %s1780_s18 = sphi %s1841_s18, %s2335_s18  }
   0x6   : > { %p48_p0 = scmp.ne.s32.totalorder %s1788_s20, %s1784_s19  ;;  %p49_p1 = scmp.eq.s32.totalorder %s1800_s23, 0 }
   0x7   : > { %p54_p2 = scmp.ne.s32.totalorder %s1784_s19, %s1780_s18  ;;  %p1875_p3 = scmp.eq.s32.totalorder %s1312_s24, 0 }
   0x8   : > { %p1879_p4 = por %p49_p1, %p48_p0  ;;  %p1314_p5 = scmp.ge.s32.totalorder %s1800_s23, 1 }
   0x9   : > { %p1886_p6 = por %p1875_p3, %p54_p2  ;;  %p191_p7 = scmp.lt.s32.totalorder %s1800_s23, 3 }
   0xa   : > { %s203_s6 = sshll.u32 %s2317_s1, 4  ;;  %s1802_s8 = smov [#allocation4]   ;;  %s204_s6 = int_to_ptr.hbm [resolvable:$true] %s203_s6 }
   0xb   : > { %p1894_p8 = pnand %p1314_p5, %p191_p7  ;;  %s205_s9 = sshll.u32 %s1802_s8, 4  ;;  %s206_s9 = int_to_ptr.vmem [resolvable:$true] %s205_s9 }
   0xc   : > { %p1579_p10 = scmp.lt.s32.totalorder %s1800_s23, 2  ;;  %s214_s12 = sshll.u32 %s2318_s2, 4  ;;  %s215_s12 = int_to_ptr.hbm [resolvable:$true] %s214_s12 }
   0xd   : > { %p1566_p9 = pneg %p1894_p8  ;;  %s1803_s14 = smov [#allocation6]  }
   0xe   : > { %p1908_p12 = pnand %p1579_p10, %p1879_p4  ;;  %s216_s15 = sshll.u32 %s1803_s14, 4  ;;  %s217_s15 = int_to_ptr.vmem [resolvable:$true] %s216_s15 }
   0xf   : > { %p1567_p11 = pnand %p1566_p9, %p1875_p3  ;;  %s1804_s16 = smov 192  }
  0x10   : > { %s1805_s17 = smov 12   ;;  %s230_s18 = sand.u32 1, %s1788_s20  }
  0x11   : > { %1569 = dma.hbm_to_vmem [thread:$0]  (!%p1567_p11), %s204_s6, 16, %s206_s9, [#allocation5]  }
  0x12   : > { %1572 = dma.hbm_to_vmem [thread:$0]  (!%p1567_p11), %s215_s12, 3072, %s217_s15, [#allocation5], %s1804_s16, %s1804_s16, %s1805_s17  }
  0x13   : > { %s32_s24 = sadd.s32 1, %s1796_s22  ;;  %s1318_s27 = sshll.u32 %s230_s18, 5 }
  0x14   : > { %p34_p13 = scmp.ge.s32.totalorder %s32_s24, 2  ;;  %s1501_s29 = sshll.u32 %s1796_s22, 5 }
  0x15   : > { %s241_s6 = scalar_lea.hbm %s2316_s0, %s1501_s29  ;;  %s234_s9 = scalar_lea.vmem [#allocation2], %s1318_s27 }
  0x16   : > { %s2341_s24 = smov (%p34_p13, %s32_s24), 0  ;;  %s244_s10 = sshll.u32 %s234_s9, 4  ;;  %s245_s10 = int_to_ptr.vmem [resolvable:$true] %s244_s10 }
  0x17   : > { %s36_s11 = ssub.s32 %s1796_s22, %s2341_s24  ;;  %s242_s14 = sshll.u32 %s241_s6, 4  ;;  %s243_s14 = int_to_ptr.hbm [resolvable:$true] %s242_s14 }
  0x18   : > { %p39_p0 = scmp.eq.s32.totalorder %s36_s11, 0  ;;  %s231_s15 = scalar_lea.sflag [#allocation3], %s230_s18 }
  0x19   : > { %s1806_s16 = smov 64   ;;  %s1807_s17 = smov 4  }
  0x1a   : > { %s1925_s12 = scalar_select %p39_p0, %s1788_s20, %s41_s25  }
  0x1b   : > { %1576 = dma.hbm_to_vmem [thread:$0]  (!%p1908_p12), %s243_s14, 512, %s245_s10, %s231_s15, %s1806_s16, %s1806_s16, %s1807_s17  }
  0x1c   : > { %256 = sbr.rel (%p1894_p8) target bundleno = 556 (0x22c), region = 32  ;;  %s258_s27 = sand.u32 (!%p1894_p8), 1, %s1784_s19  }
  0x1d   : > { %s1322_s29 = sshll.u32 (!%p1894_p8), %s258_s27, 5  ;;  %s259_s30 = scalar_lea.sflag (!%p1894_p8), [#allocation3], %s258_s27 }
  0x1e   : > { %s262_s8 = scalar_lea.vmem (!%p1894_p8), [#allocation2], %s1322_s29 }
  0x21   : > { %1771 = dma.done.wait (%p1886_p6), %s259_s30, 512  }
  0x22   : > { %1773 = vsyncadd (%p1886_p6), %s259_s30, 4294966784 }
  0x23   : > { %1775 = dma.done.wait (%p1875_p3), [#allocation5], 3088  }
  0x24   : > { %1777 = vsyncadd (%p1875_p3), [#allocation5], 4294964208  ;;  %v1545_v0 = vld [vmem:[%s262_s8 + $0x8] sm:$0xff]   ;;  %v1530_v1 = vld [vmem:[%s262_s8] sm:$0xff]   ;;  %p324_p1 = scmp.lt.s32.totalorder %s1792_s21, 1  ;;  %s1809_s9 = smov 96  }
  0x25   : > { %v1546_v2 = vld [vmem:[%s262_s8 + $0x10] sm:$0xff]   ;;  %v1940_v3 = vunpack.c.l.bf16 %v1545_v0  ;;  %v1942_v4 = vunpack.c.l.bf16 %v1530_v1  ;;  %v1952_v9 = vunpack.c.h.bf16 %v1545_v0  ;;  %v1954_v10 = vunpack.c.h.bf16 %v1530_v1  ;;  %v1547_v15 = vld [vmem:[%s262_s8 + $0x18] sm:$0xff]   ;;  %v1417_v20 = vld [vmem:[#allocation6 + $0xa8] sm:$0xf]  ;;  %s1810_s15 = smov 32  }
  0x26   : > { %v1944_v5 = vunpack.c.l.bf16 %v1546_v2  ;;  %v1956_v11 = vunpack.c.h.bf16 %v1546_v2  ;;  %v1964_v16 = vunpack.c.h.bf16 %v1547_v15  ;;  %v1966_v17 = vunpack.c.l.bf16 %v1547_v15  ;;  %v1527_v21 = vld [vmem:[#allocation6 + $0xb0] sm:$0xf0]  ;;  %v1526_v22 = vld [vmem:[#allocation6 + $0xac] sm:$0xf]  ;;  %v1419_v24 = vld [vmem:[#allocation6 + $0xb4] sm:$0xf0] }
  0x27   : > { %v371_v6 = vmul.f32 %v1940_v3, %v1940_v3  ;;  %v369_v7 = vmul.f32 %v1942_v4, %v1942_v4  ;;  %v372_v12 = vmul.f32 %v1952_v9, %v1952_v9  ;;  %v370_v13 = vmul.f32 %v1954_v10, %v1954_v10  ;;  %v1425_v25 = vld [vmem:[#allocation6 + $0xb0] sm:$0xf]  ;;  %v1528_v26 = vld [vmem:[#allocation6 + $0xb8] sm:$0xf0]  ;;  %v1523_v31 = vld [vmem:[#allocation6 + $0x94] sm:$0xf] }
  0x28   : > { %v373_v8 = vmul.f32 %v1944_v5, %v1944_v5  ;;  %v374_v14 = vmul.f32 %v1956_v11, %v1956_v11  ;;  %v376_v18 = vmul.f32 %v1964_v16, %v1964_v16  ;;  %v375_v19 = vmul.f32 %v1966_v17, %v1966_v17  ;;  %v1405_v29 = vld [vmem:[#allocation6 + $0x90] sm:$0xf]  ;;  %v1524_v30 = vld [vmem:[#allocation6 + $0x98] sm:$0xf0]  ;;  %v1407_v33 = vld [vmem:[#allocation6 + $0x9c] sm:$0xf0] }
  0x29   : > { %381 = vadd.xlane.f32.xlu1 %v371_v6  ;;  %377 = vadd.xlane.f32.xlu0 %v369_v7  ;;  %v1418_v23 = vor.u32 %v1527_v21, %v1417_v20  ;;  %v1422_v27 = vor.u32 %v1526_v22, %v1419_v24  ;;  %v1426_v28 = vor.u32 %v1528_v26, %v1425_v25  ;;  %v1413_v34 = vld [vmem:[#allocation6 + $0x98] sm:$0xf]  ;;  %v1525_v35 = vld [vmem:[#allocation6 + $0xa0] sm:$0xf0]  ;;  %v1520_v40 = vld [vmem:[#allocation6 + $0x7c] sm:$0xf] }
  0x2a   : > { %385 = vadd.xlane.f32.xlu2 %v373_v8  ;;  %v1406_v32 = vor.u32 %v1524_v30, %v1405_v29  ;;  %v1410_v36 = vor.u32 %v1523_v31, %v1407_v33  ;;  %v1414_v37 = vor.u32 %v1525_v35, %v1413_v34  ;;  %v1393_v38 = vld [vmem:[#allocation6 + $0x78] sm:$0xf]  ;;  %v1521_v39 = vld [vmem:[#allocation6 + $0x80] sm:$0xf0]  ;;  %v1395_v42 = vld [vmem:[#allocation6 + $0x84] sm:$0xf0] }
  0x2b   : > { %665 = vmatpush.bf16.msra.mxu0 %v1418_v23  ;;  %1548 = vmatpush.bf16.msra.mxu3 %v1418_v23  ;;  %v1394_v41 = vor.u32 %v1521_v39, %v1393_v38  ;;  %v1401_v43 = vld [vmem:[#allocation6 + $0x80] sm:$0xf]  ;;  %v1522_v44 = vld [vmem:[#allocation6 + $0x88] sm:$0xf0]  ;;  %v1398_v45 = vor.u32 %v1520_v40, %v1395_v42  ;;  %v1517_v49 = vld [vmem:[#allocation6 + $0x64] sm:$0xf] }
  0x2c   : > { %694 = vmatpush.bf16.msra.mxu1 %v1422_v27  ;;  %723 = vmatpush.bf16.msra.mxu2 %v1426_v28  ;;  %v1402_v46 = vor.u32 %v1522_v44, %v1401_v43  ;;  %v1381_v47 = vld [vmem:[#allocation6 + $0x60] sm:$0xf]  ;;  %v1518_v48 = vld [vmem:[#allocation6 + $0x68] sm:$0xf0]  ;;  %v1383_v51 = vld [vmem:[#allocation6 + $0x6c] sm:$0xf0] }
  0x2d   : > { %v1382_v50 = vor.u32 %v1518_v48, %v1381_v47  ;;  %v1389_v52 = vld [vmem:[#allocation6 + $0x68] sm:$0xf]  ;;  %v1519_v53 = vld [vmem:[#allocation6 + $0x70] sm:$0xf0]  ;;  %v1386_v54 = vor.u32 %v1517_v49, %v1383_v51  ;;  %v1514_v58 = vld [vmem:[#allocation6 + $0x4c] sm:$0xf] }
  0x2e   : > { %v1390_v55 = vor.u32 %v1519_v53, %v1389_v52  ;;  %v1369_v56 = vld [vmem:[#allocation6 + $0x48] sm:$0xf]  ;;  %v1515_v57 = vld [vmem:[#allocation6 + $0x50] sm:$0xf0]  ;;  %v1371_v60 = vld [vmem:[#allocation6 + $0x54] sm:$0xf0] }
  0x2f   : > { %666 = vmatpush.bf16.msra.mxu0 %v1406_v32  ;;  %1549 = vmatpush.bf16.msra.mxu3 %v1406_v32  ;;  %v1370_v59 = vor.u32 %v1515_v57, %v1369_v56  ;;  %v1377_v61 = vld [vmem:[#allocation6 + $0x50] sm:$0xf]  ;;  %v1516_v62 = vld [vmem:[#allocation6 + $0x58] sm:$0xf0]  ;;  %v1374_v63 = vor.u32 %v1514_v58, %v1371_v60  ;;  %v1511_v6 = vld [vmem:[#allocation6 + $0x34] sm:$0xf] }
  0x30   : > { %695 = vmatpush.bf16.msra.mxu1 %v1410_v36  ;;  %724 = vmatpush.bf16.msra.mxu2 %v1414_v37  ;;  %v1378_v0 = vor.u32 %v1516_v62, %v1377_v61  ;;  %v1357_v1 = vld [vmem:[#allocation6 + $0x30] sm:$0xf]  ;;  %v1512_v2 = vld [vmem:[#allocation6 + $0x38] sm:$0xf0]  ;;  %v1359_v8 = vld [vmem:[#allocation6 + $0x3c] sm:$0xf0] }
  0x31   : > { %383 = vadd.xlane.f32.xlu1 %v372_v12  ;;  %379 = vadd.xlane.f32.xlu0 %v370_v13  ;;  %v1358_v7 = vor.u32 %v1512_v2, %v1357_v1  ;;  %v1365_v12 = vld [vmem:[#allocation6 + $0x38] sm:$0xf]  ;;  %v1513_v13 = vld [vmem:[#allocation6 + $0x40] sm:$0xf0]  ;;  %v1508_v20 = vld [vmem:[#allocation6 + $0x1c] sm:$0xf] }
  0x32   : > { %387 = vadd.xlane.f32.xlu2 %v374_v14  ;;  %v1362_v14 = vor.u32 %v1511_v6, %v1359_v8  ;;  %v1366_v15 = vor.u32 %v1513_v13, %v1365_v12  ;;  %v1347_v22 = vld [vmem:[#allocation6 + $0x24] sm:$0xf0]  ;;  %v1353_v23 = vld [vmem:[#allocation6 + $0x20] sm:$0xf]  ;;  %v1510_v24 = vld [vmem:[#allocation6 + $0x28] sm:$0xf0] }
  0x33   : > { %667 = vmatpush.bf16.msra.mxu0 %v1394_v41  ;;  %1550 = vmatpush.bf16.msra.mxu3 %v1394_v41  ;;  %v1350_v25 = vor.u32 %v1508_v20, %v1347_v22  ;;  %v1354_v26 = vor.u32 %v1510_v24, %v1353_v23  ;;  %v1333_v27 = vld [vmem:[#allocation6] sm:$0xf]  ;;  %v1506_v28 = vld [vmem:[#allocation6 + $0x8] sm:$0xf0]  ;;  %v1505_v29 = vld [vmem:[#allocation6 + $0x4] sm:$0xf] }
  0x34   : > { %696 = vmatpush.bf16.msra.mxu1 %v1398_v45  ;;  %725 = vmatpush.bf16.msra.mxu2 %v1402_v46  ;;  %v1334_v30 = vor.u32 %v1506_v28, %v1333_v27  ;;  %v1335_v31 = vld [vmem:[#allocation6 + $0xc] sm:$0xf0]  ;;  %v1341_v32 = vld [vmem:[#allocation6 + $0x8] sm:$0xf]  ;;  %v1507_v33 = vld [vmem:[#allocation6 + $0x10] sm:$0xf0] }
  0x35   : > { %v1338_v34 = vor.u32 %v1505_v29, %v1335_v31  ;;  %v1342_v35 = vor.u32 %v1507_v33, %v1341_v32  ;;  %s2343_s21 = smov (!%p324_p1, %s1792_s21), 1 }
  0x36   : > { %s1502_s25 = sshll.u32 %s2343_s21, 7  ;;  %s1808_s21 = smov 64  }
  0x37   : > { %668 = vmatpush.bf16.msra.mxu0 %v1382_v50  ;;  %1551 = vmatpush.bf16.msra.mxu3 %v1382_v50  ;;  %s2040_s7 = scalar_lea.vmem %s2319_s3, %s1502_s25  ;;  %s2045_s6 = scalar_lea.vmem %s2320_s4, %s1502_s25 }
  0x38   : > { %697 = vmatpush.bf16.msra.mxu1 %v1386_v54  ;;  %726 = vmatpush.bf16.msra.mxu2 %v1390_v55  ;;  %s2056_s14 = scalar_lea.vmem %s2321_s5, %s1502_s25 }
  0x39   : > { %391 = vadd.xlane.f32.xlu1 %v376_v18  ;;  %389 = vadd.xlane.f32.xlu0 %v375_v19  ;;  %v1345_v18 = vld [vmem:[#allocation6 + $0x18] sm:$0xf]  ;;  %v1509_v19 = vld [vmem:[#allocation6 + $0x20] sm:$0xf0] }
  0x3a   : > { %v1346_v21 = vor.u32 %v1509_v19, %v1345_v18 }
  0x3b   : > { %669 = vmatpush.bf16.msra.mxu0 %v1370_v59  ;;  %1552 = vmatpush.bf16.msra.mxu3 %v1370_v59 }
  0x3c   : > { %698 = vmatpush.bf16.msra.mxu1 %v1374_v63  ;;  %727 = vmatpush.bf16.msra.mxu2 %v1378_v0 }
  0x3f   : > { %670 = vmatpush.bf16.msra.mxu0 %v1358_v7  ;;  %1553 = vmatpush.bf16.msra.mxu3 %v1358_v7 }
  0x40   : > { %699 = vmatpush.bf16.msra.mxu1 %v1362_v14  ;;  %728 = vmatpush.bf16.msra.mxu2 %v1366_v15 }
  0x43   : > { %671 = vmatpush.bf16.msra.mxu0 %v1346_v21  ;;  %1554 = vmatpush.bf16.msra.mxu3 %v1346_v21 }
  0x44   : > { %700 = vmatpush.bf16.msra.mxu1 %v1350_v25  ;;  %729 = vmatpush.bf16.msra.mxu2 %v1354_v26 }
  0x47   : > { %672 = vmatpush.bf16.msra.mxu0 %v1334_v30  ;;  %1555 = vmatpush.bf16.msra.mxu3 %v1334_v30 }
  0x48   : > { %701 = vmatpush.bf16.msra.mxu1 %v1338_v34  ;;  %730 = vmatpush.bf16.msra.mxu2 %v1342_v35  ;;  %v1639_v35 = vld [vmem:[#allocation4] ss:$0 sm:$0xff] }
  0x9c   : > { %v382_v36 = vpop.xlane.xlu1 %381  ;;  %v378_v37 = vpop.xlane.xlu0 %377 }
  0x9d   : > { %v395_v38 = vmax.f32 %v382_v36, 1e-24  ;;  %v393_v39 = vmax.f32 %v378_v37, 1e-24  ;;  %v386_v40 = vpop.xlane.xlu2 %385 }
  0x9e   : > { %v1972_v41 = vmax.f32 %v386_v40, 1e-24 }
  0x9f   : > { %1640 = vrsqrt.f32 %v395_v38  ;;  %vm427_vm0 = vweird.f32 %v395_v38  ;;  %vm407_vm6 = vweird.f32 %v393_v39 }
  0xa0   : > { %1642 = vrsqrt.f32 %v393_v39  ;;  %vm447_vm12 = vweird.f32 %v1972_v41 }
  0xa1   : > { %1644 = vrsqrt.f32 %v1972_v41 }
  0xa4   : > { %v384_v42 = vpop.xlane.xlu1 %383  ;;  %v380_v43 = vpop.xlane.xlu0 %379 }
  0xa5   : > { %v1641_v44 = vpop.eup %1640  ;;  %v396_v45 = vmax.f32 %v384_v42, 1e-24  ;;  %v394_v46 = vmax.f32 %v380_v43, 1e-24  ;;  %v388_v47 = vpop.xlane.xlu2 %387 }
  0xa6   : > { %v1643_v48 = vpop.eup %1642  ;;  %v422_v49 = vmul.f32 %v1641_v44, %v395_v38  ;;  %v1975_v50 = vmax.f32 %v388_v47, 1e-24  ;;  %vm428_vm1 = vweird.f32 %v1641_v44 }
  0xa7   : > { %v402_v51 = vmul.f32 %v1643_v48, %v393_v39  ;;  %1646 = vrsqrt.f32 %v396_v45  ;;  %v1977_v52 = vpop.eup %1644  ;;  %vm1984_vm2 = vmor %vm427_vm0, %vm428_vm1  ;;  %vm408_vm3 = vweird.f32 %v1643_v48  ;;  %vm437_vm4 = vweird.f32 %v396_v45 }
  0xa8   : > { %v423_v53 = vmul.f32 %v1641_v44, %v422_v49  ;;  %1648 = vrsqrt.f32 %v394_v46  ;;  %v442_v57 = vmul.f32 %v1977_v52, %v1972_v41  ;;  %vm1996_vm7 = vmor %vm407_vm6, %vm408_vm3  ;;  %vm417_vm10 = vweird.f32 %v394_v46 }
  0xa9   : > { %v403_v54 = vmul.f32 %v1643_v48, %v402_v51  ;;  %1650 = vrsqrt.f32 %v1975_v50  ;;  %vm448_vm13 = vweird.f32 %v1977_v52  ;;  %vm457_vm14 = vweird.f32 %v1975_v50 }
  0xaa   : > { %v424_v55 = vmul.f32 0.5, %v423_v53  ;;  %v443_v6 = vmul.f32 %v1977_v52, %v442_v57  ;;  %vm2020_vm0 = vmor %vm447_vm12, %vm448_vm13 }
  0xab   : > { %v404_v56 = vmul.f32 0.5, %v403_v54 }
  0xac   : > { %v425_v58 = vsub.f32 1.5, %v424_v55  ;;  %v392_v14 = vpop.xlane.xlu1 %391  ;;  %v390_v15 = vpop.xlane.xlu0 %389  ;;  %v444_v22 = vmul.f32 0.5, %v443_v6 }
  0xad   : > { %v1647_v59 = vpop.eup %1646  ;;  %v405_v60 = vsub.f32 1.5, %v404_v56  ;;  %v1994_v23 = vmax.f32 %v392_v14, 1e-24  ;;  %v399_v27 = vmax.f32 %v390_v15, 1e-24 }
  0xae   : > { %v1649_v61 = vpop.eup %1648  ;;  %v426_v62 = vmul.f32 %v1641_v44, %v425_v58  ;;  %v432_v63 = vmul.f32 %v1647_v59, %v396_v45  ;;  %vm438_vm5 = vweird.f32 %v1647_v59  ;;  %v445_v34 = vsub.f32 1.5, %v444_v22 }
  0xaf   : > { %v1982_v0 = vpop.eup %1650  ;;  %v412_v2 = vmul.f32 %v1649_v61, %v394_v46  ;;  %v406_v12 = vmul.f32 %v1643_v48, %v405_v60  ;;  %vm418_vm8 = vweird.f32 %v1649_v61  ;;  %vm2003_vm9 = vmor %vm437_vm4, %vm438_vm5  ;;  %1652 = vrsqrt.f32 %v1994_v23 }
  0xb0   : > { %v433_v7 = vmul.f32 %v1647_v59, %v432_v63  ;;  %v452_v8 = vmul.f32 %v1982_v0, %v1975_v50  ;;  %v430_v18 = vsel %vm1984_vm2, %v1641_v44, %v426_v62  ;;  %1654 = vrsqrt.f32 %v399_v27  ;;  %vm419_vm11 = vmor %vm417_vm10, %vm418_vm8 }
  0xb1   : > { %v413_v13 = vmul.f32 %v1649_v61, %v412_v2  ;;  %v410_v28 = vsel %vm1996_vm7, %v1643_v48, %v406_v12  ;;  %v483_v31 = vmul.f32 %v1940_v3, %v430_v18  ;;  %vm458_vm15 = vweird.f32 %v1982_v0 }
  0xb2   : > { %v434_v19 = vmul.f32 0.5, %v433_v7  ;;  %v453_v20 = vmul.f32 %v1982_v0, %v452_v8  ;;  %v481_v38 = vmul.f32 %v1942_v4, %v410_v28  ;;  %v446_v44 = vmul.f32 %v1977_v52, %v445_v34  ;;  %vm459_vm1 = vmor %vm457_vm14, %vm458_vm15 }
  0xb3   : > { %v414_v21 = vmul.f32 0.5, %v413_v13  ;;  %v495_v40 = vmul.f32 %v1639_v35, %v483_v31  ;;  %vm477_vm2 = vweird.f32 %v1994_v23  ;;  %vm467_vm4 = vweird.f32 %v399_v27 }
  0xb4   : > { %v435_v25 = vsub.f32 1.5, %v434_v19  ;;  %v454_v26 = vmul.f32 0.5, %v453_v20  ;;  %v493_v47 = vmul.f32 %v1639_v35, %v481_v38  ;;  %vm768_vm8 = vcmask 257024  }
  0xb5   : > { %v415_v30 = vsub.f32 1.5, %v414_v21  ;;  %v1653_v43 = vpop.eup %1652 }
  0xb6   : > { %v436_v32 = vmul.f32 %v1647_v59, %v435_v25  ;;  %v455_v37 = vsub.f32 1.5, %v454_v26  ;;  %v1655_v41 = vpop.eup %1654  ;;  %v472_v48 = vmul.f32 %v1653_v43, %v1994_v23  ;;  %vm478_vm3 = vweird.f32 %v1653_v43 }
  0xb7   : > { %v416_v33 = vmul.f32 %v1649_v61, %v415_v30  ;;  %v462_v50 = vmul.f32 %v1655_v41, %v399_v27  ;;  %vm468_vm5 = vweird.f32 %v1655_v41  ;;  %vm479_vm6 = vmor %vm477_vm2, %vm478_vm3 }
  0xb8   : > { %v440_v36 = vsel %vm2003_vm9, %v1647_v59, %v436_v32  ;;  %v456_v4 = vmul.f32 %v1982_v0, %v455_v37  ;;  %v473_v54 = vmul.f32 %v1653_v43, %v472_v48  ;;  %vm469_vm7 = vmor %vm467_vm4, %vm468_vm5 }
  0xb9   : > { %v420_v39 = vsel %vm419_vm11, %v1649_v61, %v416_v33  ;;  %v484_v3 = vmul.f32 %v1952_v9, %v440_v36  ;;  %v463_v55 = vmul.f32 %v1655_v41, %v462_v50 }
  0xba   : > { %v482_v42 = vmul.f32 %v1954_v10, %v420_v39  ;;  %v450_v10 = vsel %vm2020_vm0, %v1977_v52, %v446_v44  ;;  %v460_v53 = vsel %vm459_vm1, %v1982_v0, %v456_v4  ;;  %v474_v58 = vmul.f32 0.5, %v473_v54 }
  0xbb   : > { %v496_v45 = vmul.f32 %v1639_v35, %v484_v3  ;;  %v485_v56 = vmul.f32 %v1944_v5, %v450_v10  ;;  %v486_v57 = vmul.f32 %v1956_v11, %v460_v53  ;;  %v464_v59 = vmul.f32 0.5, %v463_v55 }
  0xbc   : > { %v494_v9 = vmul.f32 %v1639_v35, %v482_v42  ;;  %v475_v62 = vsub.f32 1.5, %v474_v58 }
  0xbd   : > { %v502_v49 = vpack.c.bf16 %v496_v45, %v495_v40  ;;  %v497_v60 = vmul.f32 %v1639_v35, %v485_v56  ;;  %v498_v61 = vmul.f32 %v1639_v35, %v486_v57  ;;  %v465_v63 = vsub.f32 1.5, %v464_v59 }
  0xbe   : > { %v501_v51 = vpack.c.bf16 %v494_v9, %v493_v47  ;;  %v476_v0 = vmul.f32 %v1653_v43, %v475_v62 }
  0xbf   : > { %678 = vmatmul.bf16.vlgmr.msra.gmra.mxu3 %v502_v49  ;;  %v503_v52 = vpack.c.bf16 %v498_v61, %v497_v60  ;;  %v466_v1 = vmul.f32 %v1655_v41, %v465_v63 }
  0xc0   : > { %673 = vmatmul.bf16.vlgmr.msra.gmra.mxu0 %v501_v51  ;;  %702 = vmatmul.bf16.vlgmr.msra.gmra.mxu1 %v501_v51  ;;  %v480_v5 = vsel %vm479_vm6, %v1653_v43, %v476_v0 }
  0xc1   : > { %731 = vmatmul.bf16.vlgmr.msra.gmra.mxu2 %v501_v51  ;;  %v470_v11 = vsel %vm469_vm7, %v1655_v41, %v466_v1  ;;  %v488_v6 = vmul.f32 %v1964_v16, %v480_v5 }
  0xc2   : > { %v487_v2 = vmul.f32 %v1966_v17, %v470_v11 }
  0xc3   : > { %v500_v8 = vmul.f32 %v1639_v35, %v488_v6 }
  0xc4   : > { %v499_v7 = vmul.f32 %v1639_v35, %v487_v2 }
  0xc6   : > { %v504_v12 = vpack.c.bf16 %v500_v8, %v499_v7 }
  0xcf   : > { %683 = vmatmul.bf16.gmra.mxu3 %v503_v52 }
  0xd0   : > { %707 = vmatmul.bf16.gmra.mxu1 %v502_v49 }
  0xd1   : > { %736 = vmatmul.bf16.gmra.mxu2 %v502_v49 }
  0xdf   : > { %688 = vmatmul.bf16.gmra.mxu3 %v504_v12 }
  0xe0   : > { %712 = vmatmul.bf16.gmra.mxu1 %v503_v52 }
  0xe1   : > { %741 = vmatmul.bf16.gmra.mxu2 %v503_v52 }
  0xf0   : > { %717 = vmatmul.bf16.gmra.mxu1 %v504_v12 }
  0xf1   : > { %746 = vmatmul.bf16.gmra.mxu2 %v504_v12 }
 0x13d   : > { %v674_v17 = vpop.f32.mrf.mxu0  ;;  %v703_v13 = vpop.f32.mrf.mxu1 }
 0x13e   : > { %v752_v16 = vpack.c.bf16 %v703_v13, %v674_v17 }
 0x140   : > { %769 = vst.msk [vmem:[%s2040_s7] sm:$0xf] %vm768_vm8, %v752_v16  ;;  %v785_v14 = vrot.slane %v752_v16, 4  ;;  %916 = vrot.lane.b32.xlu0 %v752_v16, %s1808_s21  ;;  %817 = vrot.lane.b32.xlu2 %v752_v16, %s1809_s9 }
 0x142   : > { %801 = vst.msk [vmem:[%s2045_s6] sm:$0xf] %vm768_vm8, %v785_v14  ;;  %v679_v15 = vpop.f32.mrf.mxu3 }
 0x144   : > { %v732_v18 = vpop.f32.mrf.mxu2 }
 0x145   : > { %v753_v19 = vpack.c.bf16 %v732_v18, %v732_v18  ;;  %v676_v20 = vpop.f32.mrf.mxu0  ;;  %v705_v21 = vpop.f32.mrf.mxu1 }
 0x146   : > { %v754_v22 = vpack.c.bf16 %v705_v21, %v676_v20 }
 0x147   : > { %809 = vst.msk [vmem:[%s2056_s14] sm:$0xf] %vm768_vm8, %v753_v19  ;;  %974 = vrot.lane.b32.xlu1 %v753_v19, %s1808_s21 }
 0x148   : > { %770 = vst.msk [vmem:[%s2040_s7 + $0x4] sm:$0xf] %vm768_vm8, %v754_v22  ;;  %v786_v23 = vrot.slane %v754_v22, 4  ;;  %1065 = vrot.lane.b32.xlu0 %v753_v19, %s1810_s15  ;;  %1007 = vrot.lane.b32.xlu2 %v752_v16, %s1810_s15 }
 0x14a   : > { %802 = vst.msk [vmem:[%s2045_s6 + $0x4] sm:$0xf] %vm768_vm8, %v786_v23  ;;  %v681_v28 = vpop.f32.mrf.mxu3 }
 0x14c   : > { %v734_v24 = vpop.f32.mrf.mxu2 }
 0x14d   : > { %v755_v25 = vpack.c.bf16 %v734_v24, %v734_v24  ;;  %v708_v26 = vpop.f32.mrf.mxu1 }
 0x14e   : > { %v756_v27 = vpack.c.bf16 %v708_v26, %v679_v15 }
 0x14f   : > { %810 = vst.msk [vmem:[%s2056_s14 + $0x4] sm:$0xf] %vm768_vm8, %v755_v25  ;;  %1009 = vrot.lane.b32.xlu1 %v754_v22, %s1810_s15 }
 0x150   : > { %771 = vst.msk [vmem:[%s2040_s7 + $0x8] sm:$0xf] %vm768_vm8, %v756_v27  ;;  %v787_v29 = vrot.slane %v756_v27, 4  ;;  %883 = vrot.lane.b32.xlu2 %v753_v19, %s1809_s9  ;;  %819 = vrot.lane.b32.xlu0 %v754_v22, %s1809_s9 }
 0x152   : > { %803 = vst.msk [vmem:[%s2045_s6 + $0x8] sm:$0xf] %vm768_vm8, %v787_v29  ;;  %v684_v34 = vpop.f32.mrf.mxu3 }
 0x154   : > { %v737_v30 = vpop.f32.mrf.mxu2 }
 0x155   : > { %v757_v31 = vpack.c.bf16 %v737_v30, %v737_v30  ;;  %v710_v32 = vpop.f32.mrf.mxu1 }
 0x156   : > { %v758_v33 = vpack.c.bf16 %v710_v32, %v681_v28 }
 0x157   : > { %811 = vst.msk [vmem:[%s2056_s14 + $0x8] sm:$0xf] %vm768_vm8, %v757_v31  ;;  %885 = vrot.lane.b32.xlu1 %v755_v25, %s1809_s9 }
 0x158   : > { %772 = vst.msk [vmem:[%s2040_s7 + $0xc] sm:$0xf] %vm768_vm8, %v758_v33  ;;  %v788_v35 = vrot.slane %v758_v33, 4  ;;  %918 = vrot.lane.b32.xlu2 %v754_v22, %s1808_s21  ;;  %976 = vrot.lane.b32.xlu0 %v755_v25, %s1808_s21 }
 0x15a   : > { %804 = vst.msk [vmem:[%s2045_s6 + $0xc] sm:$0xf] %vm768_vm8, %v788_v35  ;;  %v686_v40 = vpop.f32.mrf.mxu3 }
 0x15c   : > { %v739_v36 = vpop.f32.mrf.mxu2 }
 0x15d   : > { %v759_v37 = vpack.c.bf16 %v739_v36, %v739_v36  ;;  %v713_v38 = vpop.f32.mrf.mxu1 }
 0x15e   : > { %v760_v39 = vpack.c.bf16 %v713_v38, %v684_v34 }
 0x15f   : > { %812 = vst.msk [vmem:[%s2056_s14 + $0xc] sm:$0xf] %vm768_vm8, %v759_v37  ;;  %821 = vrot.lane.b32.xlu1 %v756_v27, %s1809_s9 }
 0x160   : > { %773 = vst.msk [vmem:[%s2040_s7 + $0x10] sm:$0xf] %vm768_vm8, %v760_v39  ;;  %v789_v3 = vrot.slane %v760_v39, 4  ;;  %1067 = vrot.lane.b32.xlu2 %v755_v25, %s1810_s15  ;;  %1011 = vrot.lane.b32.xlu0 %v756_v27, %s1810_s15 }
 0x162   : > { %805 = vst.msk [vmem:[%s2045_s6 + $0x10] sm:$0xf] %vm768_vm8, %v789_v3  ;;  %v689_v46 = vpop.f32.mrf.mxu3 }
 0x164   : > { %v742_v42 = vpop.f32.mrf.mxu2 }
 0x165   : > { %v761_v43 = vpack.c.bf16 %v742_v42, %v742_v42  ;;  %v715_v44 = vpop.f32.mrf.mxu1 }
 0x166   : > { %v762_v45 = vpack.c.bf16 %v715_v44, %v686_v40 }
 0x167   : > { %813 = vst.msk [vmem:[%s2056_s14 + $0x10] sm:$0xf] %vm768_vm8, %v761_v43  ;;  %920 = vrot.lane.b32.xlu1 %v756_v27, %s1808_s21 }
 0x168   : > { %774 = vst.msk [vmem:[%s2040_s7 + $0x14] sm:$0xf] %vm768_vm8, %v762_v45  ;;  %v790_v41 = vrot.slane %v762_v45, 4  ;;  %978 = vrot.lane.b32.xlu2 %v757_v31, %s1808_s21  ;;  %887 = vrot.lane.b32.xlu0 %v757_v31, %s1809_s9 }
 0x16a   : > { %806 = vst.msk [vmem:[%s2045_s6 + $0x14] sm:$0xf] %vm768_vm8, %v790_v41  ;;  %v691_v50 = vpop.f32.mrf.mxu3 }
 0x16c   : > { %v744_v4 = vpop.f32.mrf.mxu2 }
 0x16d   : > { %v2103_v47 = vpack.c.bf16 %v744_v4, %v744_v4  ;;  %v718_v9 = vpop.f32.mrf.mxu1 }
 0x16e   : > { %v764_v48 = vpack.c.bf16 %v718_v9, %v689_v46 }
 0x16f   : > { %814 = vst.msk [vmem:[%s2056_s14 + $0x14] sm:$0xf] %vm768_vm8, %v2103_v47  ;;  %1069 = vrot.lane.b32.xlu1 %v757_v31, %s1810_s15 }
 0x170   : > { %823 = vrot.lane.b32.xlu2 %v758_v33, %s1809_s9  ;;  %922 = vrot.lane.b32.xlu0 %v758_v33, %s1808_s21  ;;  %775 = vst.msk [vmem:[%s2040_s7 + $0x18] sm:$0xf] %vm768_vm8, %v764_v48  ;;  %v791_v49 = vrot.slane %v764_v48, 4 }
 0x172   : > { %807 = vst.msk [vmem:[%s2045_s6 + $0x18] sm:$0xf] %vm768_vm8, %v791_v49 }
 0x174   : > { %v747_v51 = vpop.f32.mrf.mxu2 }
 0x175   : > { %v765_v10 = vpack.c.bf16 %v747_v51, %v747_v51  ;;  %v720_v53 = vpop.f32.mrf.mxu1 }
 0x176   : > { %v766_v54 = vpack.c.bf16 %v720_v53, %v691_v50 }
 0x177   : > { %980 = vrot.lane.b32.xlu1 %v759_v37, %s1808_s21  ;;  %815 = vst.msk [vmem:[%s2056_s14 + $0x18] sm:$0xf] %vm768_vm8, %v765_v10 }
 0x178   : > { %1013 = vrot.lane.b32.xlu2 %v758_v33, %s1810_s15  ;;  %1071 = vrot.lane.b32.xlu0 %v759_v37, %s1810_s15  ;;  %776 = vst.msk [vmem:[%s2040_s7 + $0x1c] sm:$0xf] %vm768_vm8, %v766_v54  ;;  %v792_v55 = vrot.slane %v766_v54, 4 }
 0x17a   : > { %808 = vst.msk [vmem:[%s2045_s6 + $0x1c] sm:$0xf] %vm768_vm8, %v792_v55 }
 0x17c   : > { %v749_v56 = vpop.f32.mrf.mxu2 }
 0x17d   : > { %v767_v57 = vpack.c.bf16 %v749_v56, %v749_v56 }
 0x17f   : > { %1015 = vrot.lane.b32.xlu1 %v760_v39, %s1810_s15  ;;  %816 = vst.msk [vmem:[%s2056_s14 + $0x1c] sm:$0xf] %vm768_vm8, %v767_v57 }
 0x180   : > { %889 = vrot.lane.b32.xlu2 %v759_v37, %s1809_s9  ;;  %825 = vrot.lane.b32.xlu0 %v760_v39, %s1809_s9 }
 0x187   : > { %891 = vrot.lane.b32.xlu1 %v761_v43, %s1809_s9 }
 0x188   : > { %924 = vrot.lane.b32.xlu2 %v760_v39, %s1808_s21  ;;  %982 = vrot.lane.b32.xlu0 %v761_v43, %s1808_s21 }
 0x18f   : > { %926 = vrot.lane.b32.xlu1 %v762_v45, %s1808_s21 }
 0x190   : > { %1073 = vrot.lane.b32.xlu2 %v761_v43, %s1810_s15  ;;  %1017 = vrot.lane.b32.xlu0 %v762_v45, %s1810_s15 }
 0x197   : > { %829 = vrot.lane.b32.xlu1 %v764_v48, %s1809_s9 }
 0x198   : > { %827 = vrot.lane.b32.xlu2 %v762_v45, %s1809_s9  ;;  %893 = vrot.lane.b32.xlu0 %v2103_v47, %s1809_s9 }
 0x19a   : > { %v818_v58 = vpop.permute.xlu2 %817 }
 0x19b   : > { %1427 = vst.msk [vmem:[%s2040_s7 + $0x20] sm:$0xf] %vm768_vm8, %v818_v58  ;;  %v850_v59 = vrot.slane %v818_v58, 4 }
 0x19d   : > { %1435 = vst.msk [vmem:[%s2045_s6 + $0x20] sm:$0xf] %vm768_vm8, %v850_v59 }
 0x19f   : > { %986 = vrot.lane.b32.xlu1 %v765_v10, %s1808_s21 }
 0x1a0   : > { %984 = vrot.lane.b32.xlu2 %v2103_v47, %s1808_s21  ;;  %928 = vrot.lane.b32.xlu0 %v764_v48, %s1808_s21 }
 0x1a2   : > { %v1008_v60 = vpop.permute.xlu2 %1007 }
 0x1a3   : > { %1475 = vst.msk [vmem:[%s2040_s7 + $0x60] sm:$0xf] %vm768_vm8, %v1008_v60  ;;  %v1040_v61 = vrot.slane %v1008_v60, 4 }
 0x1a5   : > { %1483 = vst.msk [vmem:[%s2045_s6 + $0x60] sm:$0xf] %vm768_vm8, %v1040_v61 }
 0x1a7   : > { %1021 = vrot.lane.b32.xlu1 %v766_v54, %s1810_s15 }
 0x1a8   : > { %1019 = vrot.lane.b32.xlu2 %v764_v48, %s1810_s15  ;;  %831 = vrot.lane.b32.xlu0 %v766_v54, %s1809_s9 }
 0x1aa   : > { %v884_v62 = vpop.permute.xlu2 %883 }
 0x1ab   : > { %1443 = vst.msk [vmem:[%s2056_s14 + $0x20] sm:$0xf] %vm768_vm8, %v884_v62 }
 0x1af   : > { %897 = vrot.lane.b32.xlu1 %v767_v57, %s1809_s9 }
 0x1b0   : > { %895 = vrot.lane.b32.xlu2 %v765_v10, %s1809_s9  ;;  %988 = vrot.lane.b32.xlu0 %v767_v57, %s1808_s21 }
 0x1b2   : > { %v919_v63 = vpop.permute.xlu2 %918  ;;  %v917_v52 = vpop.permute.xlu0 %916 }
 0x1b3   : > { %1452 = vst.msk [vmem:[%s2040_s7 + $0x44] sm:$0xf] %vm768_vm8, %v919_v63  ;;  %v950_v0 = vrot.slane %v919_v63, 4  ;;  %v949_v1 = vrot.slane %v917_v52, 4 }
 0x1b4   : > { %1451 = vst.msk [vmem:[%s2040_s7 + $0x40] sm:$0xf] %vm768_vm8, %v917_v52 }
 0x1b5   : > { %1460 = vst.msk [vmem:[%s2045_s6 + $0x44] sm:$0xf] %vm768_vm8, %v950_v0 }
 0x1b6   : > { %1459 = vst.msk [vmem:[%s2045_s6 + $0x40] sm:$0xf] %vm768_vm8, %v949_v1 }
 0x1b7   : > { %1075 = vrot.lane.b32.xlu1 %v2103_v47, %s1810_s15 }
 0x1b8   : > { %930 = vrot.lane.b32.xlu2 %v766_v54, %s1808_s21  ;;  %1077 = vrot.lane.b32.xlu0 %v765_v10, %s1810_s15 }
 0x1b9   : > { %v975_v5 = vpop.permute.xlu1 %974 }
 0x1ba   : > { %1467 = vst.msk [vmem:[%s2056_s14 + $0x40] sm:$0xf] %vm768_vm8, %v975_v5  ;;  %v1068_v11 = vpop.permute.xlu2 %1067  ;;  %v1066_v2 = vpop.permute.xlu0 %1065 }
 0x1bb   : > { %1492 = vst.msk [vmem:[%s2056_s14 + $0x64] sm:$0xf] %vm768_vm8, %v1068_v11 }
 0x1bc   : > { %1491 = vst.msk [vmem:[%s2056_s14 + $0x60] sm:$0xf] %vm768_vm8, %v1066_v2 }
 0x1c0   : > { %1079 = vrot.lane.b32.xlu2 %v767_v57, %s1810_s15 }
 0x1c1   : > { %v1010_v6 = vpop.permute.xlu1 %1009 }
 0x1c2   : > { %1476 = vst.msk [vmem:[%s2040_s7 + $0x64] sm:$0xf] %vm768_vm8, %v1010_v6  ;;  %v1041_v7 = vrot.slane %v1010_v6, 4  ;;  %v979_v8 = vpop.permute.xlu2 %978  ;;  %v820_v12 = vpop.permute.xlu0 %819 }
 0x1c3   : > { %1469 = vst.msk [vmem:[%s2056_s14 + $0x48] sm:$0xf] %vm768_vm8, %v979_v8  ;;  %v851_v17 = vrot.slane %v820_v12, 4 }
 0x1c4   : > { %1484 = vst.msk [vmem:[%s2045_s6 + $0x64] sm:$0xf] %vm768_vm8, %v1041_v7 }
 0x1c5   : > { %1428 = vst.msk [vmem:[%s2040_s7 + $0x24] sm:$0xf] %vm768_vm8, %v820_v12 }
 0x1c6   : > { %1436 = vst.msk [vmem:[%s2045_s6 + $0x24] sm:$0xf] %vm768_vm8, %v851_v17 }
 0x1c9   : > { %v886_v13 = vpop.permute.xlu1 %885 }
 0x1ca   : > { %1444 = vst.msk [vmem:[%s2056_s14 + $0x24] sm:$0xf] %vm768_vm8, %v886_v13  ;;  %v824_v16 = vpop.permute.xlu2 %823  ;;  %v977_v14 = vpop.permute.xlu0 %976 }
 0x1cb   : > { %1430 = vst.msk [vmem:[%s2040_s7 + $0x2c] sm:$0xf] %vm768_vm8, %v824_v16  ;;  %v853_v15 = vrot.slane %v824_v16, 4 }
 0x1cc   : > { %1468 = vst.msk [vmem:[%s2056_s14 + $0x44] sm:$0xf] %vm768_vm8, %v977_v14 }
 0x1cd   : > { %1438 = vst.msk [vmem:[%s2045_s6 + $0x2c] sm:$0xf] %vm768_vm8, %v853_v15 }
 0x1d1   : > { %v822_v18 = vpop.permute.xlu1 %821 }
 0x1d2   : > { %1429 = vst.msk [vmem:[%s2040_s7 + $0x28] sm:$0xf] %vm768_vm8, %v822_v18  ;;  %v852_v19 = vrot.slane %v822_v18, 4  ;;  %v1014_v20 = vpop.permute.xlu2 %1013  ;;  %v1012_v21 = vpop.permute.xlu0 %1011 }
 0x1d3   : > { %1478 = vst.msk [vmem:[%s2040_s7 + $0x6c] sm:$0xf] %vm768_vm8, %v1014_v20  ;;  %v1043_v22 = vrot.slane %v1014_v20, 4  ;;  %v1042_v23 = vrot.slane %v1012_v21, 4 }
 0x1d4   : > { %1437 = vst.msk [vmem:[%s2045_s6 + $0x28] sm:$0xf] %vm768_vm8, %v852_v19 }
 0x1d5   : > { %1486 = vst.msk [vmem:[%s2045_s6 + $0x6c] sm:$0xf] %vm768_vm8, %v1043_v22 }
 0x1d6   : > { %1477 = vst.msk [vmem:[%s2040_s7 + $0x68] sm:$0xf] %vm768_vm8, %v1012_v21 }
 0x1d7   : > { %1485 = vst.msk [vmem:[%s2045_s6 + $0x68] sm:$0xf] %vm768_vm8, %v1042_v23 }
 0x1d9   : > { %v921_v24 = vpop.permute.xlu1 %920 }
 0x1da   : > { %1453 = vst.msk [vmem:[%s2040_s7 + $0x48] sm:$0xf] %vm768_vm8, %v921_v24  ;;  %v951_v25 = vrot.slane %v921_v24, 4  ;;  %v890_v26 = vpop.permute.xlu2 %889  ;;  %v888_v27 = vpop.permute.xlu0 %887 }
 0x1db   : > { %1446 = vst.msk [vmem:[%s2056_s14 + $0x2c] sm:$0xf] %vm768_vm8, %v890_v26 }
 0x1dc   : > { %1461 = vst.msk [vmem:[%s2045_s6 + $0x48] sm:$0xf] %vm768_vm8, %v951_v25 }
 0x1dd   : > { %1445 = vst.msk [vmem:[%s2056_s14 + $0x28] sm:$0xf] %vm768_vm8, %v888_v27 }
 0x1e1   : > { %v1070_v28 = vpop.permute.xlu1 %1069 }
 0x1e2   : > { %1493 = vst.msk [vmem:[%s2056_s14 + $0x68] sm:$0xf] %vm768_vm8, %v1070_v28  ;;  %v925_v29 = vpop.permute.xlu2 %924  ;;  %v923_v30 = vpop.permute.xlu0 %922 }
 0x1e3   : > { %1455 = vst.msk [vmem:[%s2040_s7 + $0x50] sm:$0xf] %vm768_vm8, %v925_v29  ;;  %v953_v31 = vrot.slane %v925_v29, 4  ;;  %v952_v32 = vrot.slane %v923_v30, 4 }
 0x1e4   : > { %1454 = vst.msk [vmem:[%s2040_s7 + $0x4c] sm:$0xf] %vm768_vm8, %v923_v30 }
 0x1e5   : > { %1463 = vst.msk [vmem:[%s2045_s6 + $0x50] sm:$0xf] %vm768_vm8, %v953_v31 }
 0x1e6   : > { %1462 = vst.msk [vmem:[%s2045_s6 + $0x4c] sm:$0xf] %vm768_vm8, %v952_v32 }
 0x1e9   : > { %v981_v33 = vpop.permute.xlu1 %980 }
 0x1ea   : > { %1470 = vst.msk [vmem:[%s2056_s14 + $0x4c] sm:$0xf] %vm768_vm8, %v981_v33  ;;  %v1074_v34 = vpop.permute.xlu2 %1073  ;;  %v1072_v35 = vpop.permute.xlu0 %1071 }
 0x1eb   : > { %1495 = vst.msk [vmem:[%s2056_s14 + $0x70] sm:$0xf] %vm768_vm8, %v1074_v34 }
 0x1ec   : > { %1494 = vst.msk [vmem:[%s2056_s14 + $0x6c] sm:$0xf] %vm768_vm8, %v1072_v35 }
 0x1f1   : > { %v1016_v36 = vpop.permute.xlu1 %1015 }
 0x1f2   : > { %1479 = vst.msk [vmem:[%s2040_s7 + $0x70] sm:$0xf] %vm768_vm8, %v1016_v36  ;;  %v1044_v37 = vrot.slane %v1016_v36, 4  ;;  %v828_v38 = vpop.permute.xlu2 %827  ;;  %v826_v39 = vpop.permute.xlu0 %825 }
 0x1f3   : > { %1432 = vst.msk [vmem:[%s2040_s7 + $0x34] sm:$0xf] %vm768_vm8, %v828_v38  ;;  %v855_v3 = vrot.slane %v828_v38, 4  ;;  %v854_v40 = vrot.slane %v826_v39, 4 }
 0x1f4   : > { %1487 = vst.msk [vmem:[%s2045_s6 + $0x70] sm:$0xf] %vm768_vm8, %v1044_v37 }
 0x1f5   : > { %1440 = vst.msk [vmem:[%s2045_s6 + $0x34] sm:$0xf] %vm768_vm8, %v855_v3 }
 0x1f6   : > { %1431 = vst.msk [vmem:[%s2040_s7 + $0x30] sm:$0xf] %vm768_vm8, %v826_v39 }
 0x1f7   : > { %1439 = vst.msk [vmem:[%s2045_s6 + $0x30] sm:$0xf] %vm768_vm8, %v854_v40 }
 0x1f9   : > { %v892_v42 = vpop.permute.xlu1 %891 }
 0x1fa   : > { %1447 = vst.msk [vmem:[%s2056_s14 + $0x30] sm:$0xf] %vm768_vm8, %v892_v42  ;;  %v985_v43 = vpop.permute.xlu2 %984  ;;  %v983_v44 = vpop.permute.xlu0 %982 }
 0x1fb   : > { %1472 = vst.msk [vmem:[%s2056_s14 + $0x54] sm:$0xf] %vm768_vm8, %v985_v43 }
 0x1fc   : > { %1471 = vst.msk [vmem:[%s2056_s14 + $0x50] sm:$0xf] %vm768_vm8, %v983_v44 }
 0x201   : > { %v927_v45 = vpop.permute.xlu1 %926 }
 0x202   : > { %1456 = vst.msk [vmem:[%s2040_s7 + $0x54] sm:$0xf] %vm768_vm8, %v927_v45  ;;  %v954_v41 = vrot.slane %v927_v45, 4  ;;  %v1020_v46 = vpop.permute.xlu2 %1019  ;;  %v1018_v4 = vpop.permute.xlu0 %1017 }
 0x203   : > { %1481 = vst.msk [vmem:[%s2040_s7 + $0x78] sm:$0xf] %vm768_vm8, %v1020_v46  ;;  %v1046_v47 = vrot.slane %v1020_v46, 4  ;;  %v1045_v9 = vrot.slane %v1018_v4, 4 }
 0x204   : > { %1464 = vst.msk [vmem:[%s2045_s6 + $0x54] sm:$0xf] %vm768_vm8, %v954_v41 }
 0x205   : > { %1489 = vst.msk [vmem:[%s2045_s6 + $0x78] sm:$0xf] %vm768_vm8, %v1046_v47 }
 0x206   : > { %1480 = vst.msk [vmem:[%s2040_s7 + $0x74] sm:$0xf] %vm768_vm8, %v1018_v4 }
 0x207   : > { %1488 = vst.msk [vmem:[%s2045_s6 + $0x74] sm:$0xf] %vm768_vm8, %v1045_v9 }
 0x209   : > { %v830_v48 = vpop.permute.xlu1 %829 }
 0x20a   : > { %1433 = vst.msk [vmem:[%s2040_s7 + $0x38] sm:$0xf] %vm768_vm8, %v830_v48  ;;  %v856_v49 = vrot.slane %v830_v48, 4  ;;  %v896_v50 = vpop.permute.xlu2 %895  ;;  %v894_v51 = vpop.permute.xlu0 %893 }
 0x20b   : > { %1449 = vst.msk [vmem:[%s2056_s14 + $0x38] sm:$0xf] %vm768_vm8, %v896_v50 }
 0x20c   : > { %1441 = vst.msk [vmem:[%s2045_s6 + $0x38] sm:$0xf] %vm768_vm8, %v856_v49 }
 0x20d   : > { %1448 = vst.msk [vmem:[%s2056_s14 + $0x34] sm:$0xf] %vm768_vm8, %v894_v51 }
 0x211   : > { %v987_v10 = vpop.permute.xlu1 %986 }
 0x212   : > { %1473 = vst.msk [vmem:[%s2056_s14 + $0x58] sm:$0xf] %vm768_vm8, %v987_v10  ;;  %v931_v53 = vpop.permute.xlu2 %930  ;;  %v929_v54 = vpop.permute.xlu0 %928 }
 0x213   : > { %1458 = vst.msk [vmem:[%s2040_s7 + $0x5c] sm:$0xf] %vm768_vm8, %v931_v53  ;;  %v956_v55 = vrot.slane %v931_v53, 4  ;;  %v955_v56 = vrot.slane %v929_v54, 4 }
 0x214   : > { %1457 = vst.msk [vmem:[%s2040_s7 + $0x58] sm:$0xf] %vm768_vm8, %v929_v54 }
 0x215   : > { %1466 = vst.msk [vmem:[%s2045_s6 + $0x5c] sm:$0xf] %vm768_vm8, %v956_v55 }
 0x216   : > { %1465 = vst.msk [vmem:[%s2045_s6 + $0x58] sm:$0xf] %vm768_vm8, %v955_v56 }
 0x219   : > { %v1022_v57 = vpop.permute.xlu1 %1021 }
 0x21a   : > { %1482 = vst.msk [vmem:[%s2040_s7 + $0x7c] sm:$0xf] %vm768_vm8, %v1022_v57  ;;  %v1047_v58 = vrot.slane %v1022_v57, 4  ;;  %v1080_v59 = vpop.permute.xlu2 %1079  ;;  %v832_v60 = vpop.permute.xlu0 %831 }
 0x21b   : > { %1498 = vst.msk [vmem:[%s2056_s14 + $0x7c] sm:$0xf] %vm768_vm8, %v1080_v59  ;;  %v857_v61 = vrot.slane %v832_v60, 4 }
 0x21c   : > { %1490 = vst.msk [vmem:[%s2045_s6 + $0x7c] sm:$0xf] %vm768_vm8, %v1047_v58 }
 0x21d   : > { %1434 = vst.msk [vmem:[%s2040_s7 + $0x3c] sm:$0xf] %vm768_vm8, %v832_v60 }
 0x21e   : > { %1442 = vst.msk [vmem:[%s2045_s6 + $0x3c] sm:$0xf] %vm768_vm8, %v857_v61 }
 0x221   : > { %v898_v62 = vpop.permute.xlu1 %897 }
 0x222   : > { %1450 = vst.msk [vmem:[%s2056_s14 + $0x3c] sm:$0xf] %vm768_vm8, %v898_v62  ;;  %v989_v63 = vpop.permute.xlu0 %988 }
 0x223   : > { %1474 = vst.msk [vmem:[%s2056_s14 + $0x5c] sm:$0xf] %vm768_vm8, %v989_v63 }
 0x229   : > { %v1076_v52 = vpop.permute.xlu1 %1075 }
 0x22a   : > { %1496 = vst.msk [vmem:[%s2056_s14 + $0x74] sm:$0xf] %vm768_vm8, %v1076_v52  ;;  %v1078_v0 = vpop.permute.xlu0 %1077 }
 0x22b   : > { %1497 = vst.msk [vmem:[%s2056_s14 + $0x78] sm:$0xf] %vm768_vm8, %v1078_v0 }
 0x22c PF: > { %s20_s23 = sadd.s32 1, %s1800_s23   ;;  %s2335_s18 = smov %s1784_s19 }
 0x22d   : > { %p17_p2 = scmp.ge.s32.totalorder %s20_s23, 4   ;;  %s2336_s19 = smov %s1788_s20 }
 0x22e   : > { %s2337_s20 = smov %s1925_s12  ;;  %s2338_s21 = smov %s1796_s22 }
 0x22f   : > { %s2339_s22 = smov %s2341_s24  ;;  %19 = sbr.rel (!%p17_p2) target bundleno = 5 (0x5), region = 113 }
 0x234   :  { %1178 = vsyncpa [#allocation3], 1 }
 0x235   :  { %1180 = vsyncpa [#allocation3 + $0x1], 1 }
 0x236   :  { %1181 = vsyncpa [#allocation5], 1 }

</bundles_post_ra>
